<compile_context>
chip_gen: v5e
topology: v5e:2x2
jax: 0.10.0
libtpu: 0.0.40
codegen_flags: <defaults>
</compile_context>

<pallas_src>
import jax
import jax.numpy as jnp
from jax import lax
from jax.experimental import pallas as pl
from jax.experimental.pallas import tpu as pltpu

HIDDEN = 32
INPUT_SIZE = 1
BATCH_TILE = 128          # batch lives on the 128-lane axis


def rnn_kernel(x_ref, w_ih_ref, w_hh_ref, b_ref, w_out_ref, b_out_ref, h0_ref,
               out_ref, hN_ref):
    """Transposed (batch-on-lanes) Elman RNN with fused per-step output projection.

    Shapes seen by the kernel (one batch tile of Bt=128 lanes):
      x_ref   : (T, Bt)   f32
      w_ih    : (H, 1)    f32   weight_ih_l0 (input_size == 1)
      w_hh    : (H, H)    f32   weight_hh_l0 (untransposed: we compute W_hh @ hT)
      b       : (H, 1)    f32   bias_ih + bias_hh as a column
      w_out   : (1, H)    f32   out.weight
      b_out   : (1, 1)    f32   out.bias (SMEM scalar)
      h0/hN   : (H, Bt)   f32   hidden state, transposed
      out     : (T, Bt)   f32   per-timestep output, transposed

    Recurrence (transpose of PyTorch's batch-major form):
      hT_t = tanh(W_ih @ xT_t + b + W_hh @ hT_{t-1});   yT_t = W_out @ hT_t + b_out
    """
    T = x_ref.shape[0]

    # Keep all weights resident across the whole recurrence.
    w_ih = w_ih_ref[...]          # (H, 1)
    w_hh = w_hh_ref[...]          # (H, H)
    b = b_ref[...]                # (H, 1)
    w_out = w_out_ref[...]        # (1, H)
    b_out = b_out_ref[0, 0]       # scalar from SMEM

    def step(t, h):
        # Input projection for step t: (H,1)*(1,Bt)+(H,1) -> (H,Bt).  Depends only
        # on x, so it overlaps with the MXU matmul on h (which is the serial chain).
        gin = w_ih * x_ref[pl.ds(t, 1), :] + b
        h_new = jnp.tanh(
            gin + jnp.dot(w_hh, h, preferred_element_type=jnp.float32))
        # Output projection (1,H)@(H,Bt) -> lane-dense (1,Bt) store; not on the
        # h_{t+1} dependency chain, so it hides under the recurrence.
        out_ref[pl.ds(t, 1), :] = (
            jnp.dot(w_out, h_new, preferred_element_type=jnp.float32) + b_out)
        return h_new

    # T is static; partial unroll lets tanh (EUP) co-schedule with the next MXU
    # push without blowing up code size for long sequences.
    hN_ref[...] = lax.fori_loop(0, T, step, h0_ref[...], unroll=min(T, 8))


@jax.jit
def rnn_forward(x, h_state, params):
    """x: (B, T, 1) batch-first (PyTorch batch_first=True).
    h_state: (1, B, H) or None.
    Returns (outs (B, T, 1), h_state (1, B, H))."""
    B, T, _ = x.shape
    H = HIDDEN
    Bp = ((B + BATCH_TILE - 1) // BATCH_TILE) * BATCH_TILE   # pad batch to lane tiles

    # Lane-dense, batch-on-lanes layout.
    x_tb = jnp.transpose(x.astype(jnp.float32)[..., 0], (1, 0))   # (T, B)
    x_tb = jnp.pad(x_tb, ((0, 0), (0, Bp - B)))                   # (T, Bp)

    if h_state is None:
        h0 = jnp.zeros((H, Bp), jnp.float32)
    else:
        h0 = jnp.zeros((H, Bp), jnp.float32).at[:, :B].set(
            h_state.reshape(B, H).astype(jnp.float32).T)

    w_ih = params["w_ih"].astype(jnp.float32)                              # (H, 1)
    w_hh = params["w_hh"].astype(jnp.float32)                              # (H, H)
    b_fused = (params["b_ih"] + params["b_hh"]).astype(jnp.float32).reshape(H, 1)
    w_out = params["w_out"].astype(jnp.float32).reshape(1, H)
    b_out = params["b_out"].astype(jnp.float32).reshape(1, 1)

    n_tiles = Bp // BATCH_TILE

    # TODO(synk): for very long T, add an inner "arbitrary" grid axis over T chunks
    # (h carried in a persistent (H, BATCH_TILE) scratch) so x/out stream through
    # VMEM instead of being held whole; size the chunk per generation (64 MiB v7x).
    out_tb, hN = pl.pallas_call(
        rnn_kernel,
        out_shape=(
            jax.ShapeDtypeStruct((T, Bp), jnp.float32),
            jax.ShapeDtypeStruct((H, Bp), jnp.float32),
        ),
        grid=(n_tiles,),
        in_specs=[
            pl.BlockSpec((T, BATCH_TILE), lambda bt: (0, bt)),        # x
            pl.BlockSpec((H, 1), lambda bt: (0, 0)),                  # w_ih
            pl.BlockSpec((H, H), lambda bt: (0, 0)),                  # w_hh
            pl.BlockSpec((H, 1), lambda bt: (0, 0)),                  # fused bias
            pl.BlockSpec((1, H), lambda bt: (0, 0)),                  # w_out
            pl.BlockSpec(memory_space=pltpu.MemorySpace.SMEM),        # b_out scalar
            pl.BlockSpec((H, BATCH_TILE), lambda bt: (0, bt)),        # h0
        ],
        out_specs=(
            pl.BlockSpec((T, BATCH_TILE), lambda bt: (0, bt)),        # out
            pl.BlockSpec((H, BATCH_TILE), lambda bt: (0, bt)),        # hN
        ),
        compiler_params=pltpu.CompilerParams(
            dimension_semantics=("parallel",)),   # batch tiles across v7x's 2 TCs
    )(x_tb, w_ih, w_hh, b_fused, w_out, b_out, h0)

    outs = jnp.transpose(out_tb[:, :B])[:, :, None]                  # (B, T, 1)
    h_new = jnp.transpose(hN[:, :B]).reshape(1, B, H)
    return outs, h_new


def init_params(key):
    """Deterministic init matching PyTorch's shapes (uniform +/- 1/sqrt(H))."""
    H = HIDDEN
    bound = 1.0 / jnp.sqrt(jnp.float32(H))
    ks = jax.random.split(key, 6)
    u = lambda k, shape: jax.random.uniform(k, shape, jnp.float32, -bound, bound)
    return {
        "w_ih": u(ks[0], (H, INPUT_SIZE)),   # weight_ih_l0
        "w_hh": u(ks[1], (H, H)),            # weight_hh_l0
        "b_ih": u(ks[2], (H,)),              # bias_ih_l0
        "b_hh": u(ks[3], (H,)),              # bias_hh_l0
        "w_out": u(ks[4], (1, H)),           # out.weight
        "b_out": u(ks[5], (1,)),             # out.bias
    }


def rnn_forward_ref(x, h_state, params):
    """Pure-JAX reference of the PyTorch forward, for validation."""
    B, T, _ = x.shape
    H = HIDDEN
    h = (jnp.zeros((B, H), jnp.float32) if h_state is None
         else h_state.reshape(B, H))
    outs = []
    for t in range(T):
        x_t = x[:, t, :]
        h = jnp.tanh(x_t @ params["w_ih"].T + params["b_ih"]
                     + h @ params["w_hh"].T + params["b_hh"])
        outs.append(h @ params["w_out"].T + params["b_out"])
    return jnp.stack(outs, axis=1), h.reshape(1, B, H)


if __name__ == "__main__":
    key = jax.random.PRNGKey(0)
    k_x, k_p = jax.random.split(key)

    B, T = 2, 8
    x = jax.random.normal(k_x, (B, T, INPUT_SIZE), jnp.float32)
    params = init_params(k_p)
    h_state = None  # same as the tutorial's initial hidden state

    outs, h_new = rnn_forward(x, h_state, params)
    outs = jax.block_until_ready(outs)
    h_new = jax.block_until_ready(h_new)

    outs_ref, h_ref = rnn_forward_ref(x, h_state, params)
    assert outs.shape == (B, T, 1) and h_new.shape == (1, B, HIDDEN)
    assert jnp.allclose(outs, outs_ref, atol=1e-5, rtol=1e-5)
    assert jnp.allclose(h_new, h_ref, atol=1e-5, rtol=1e-5)

    # second call feeding the returned hidden state back in (as the tutorial does)
    outs2, h_new2 = rnn_forward(x, h_new, params)
    outs2_ref, h2_ref = rnn_forward_ref(x, h_new, params)
    assert jnp.allclose(outs2, outs2_ref, atol=1e-5, rtol=1e-5)
    assert jnp.allclose(h_new2, h2_ref, atol=1e-5, rtol=1e-5)
    jax.block_until_ready(outs2)

    print("KERNEL_OK")
</pallas_src>

<mosaic_0001>
module attributes {stable_mosaic.version = 11 : i64} {
  func.func @rnn_kernel(%arg0: i32, %arg1: memref<8x128xf32, #tpu.memory_space<vmem>>, %arg2: memref<32x1xf32, #tpu.memory_space<vmem>>, %arg3: memref<32x32xf32, #tpu.memory_space<vmem>>, %arg4: memref<32x1xf32, #tpu.memory_space<vmem>>, %arg5: memref<1x32xf32, #tpu.memory_space<vmem>>, %arg6: memref<1x1xf32, #tpu.memory_space<smem>>, %arg7: memref<32x128xf32, #tpu.memory_space<vmem>>, %arg8: memref<8x128xf32, #tpu.memory_space<vmem>>, %arg9: memref<32x128xf32, #tpu.memory_space<vmem>>) attributes {dimension_semantics = [#tpu.dimension_semantics<parallel>], iteration_bounds = array<i64: 1>, scalar_prefetch = 0 : i64, scratch_operands = 0 : i64, tpu.core_type = #tpu.core_type<tc>, window_params = [{transform_indices = @transform_0, window_bounds = array<i64: 8, 128>}, {pipeline_mode = #tpu.pipeline_mode<synchronous>, transform_indices = @transform_1, window_bounds = array<i64: 32, 1>}, {pipeline_mode = #tpu.pipeline_mode<synchronous>, transform_indices = @transform_2, window_bounds = array<i64: 32, 32>}, {pipeline_mode = #tpu.pipeline_mode<synchronous>, transform_indices = @transform_3, window_bounds = array<i64: 32, 1>}, {pipeline_mode = #tpu.pipeline_mode<synchronous>, transform_indices = @transform_4, window_bounds = array<i64: 1, 32>}, {transform_indices = @transform_5, window_bounds = array<i64: 1, 1>}, {transform_indices = @transform_6, window_bounds = array<i64: 32, 128>}, {transform_indices = @transform_7, window_bounds = array<i64: 8, 128>}, {transform_indices = @transform_8, window_bounds = array<i64: 32, 128>}]} {
    %c0 = arith.constant 0 : index
    %c0_0 = arith.constant 0 : index
    %0 = vector.load %arg2[%c0, %c0_0] : memref<32x1xf32, #tpu.memory_space<vmem>>, vector<32x1xf32>
    %c0_1 = arith.constant 0 : index
    %c0_2 = arith.constant 0 : index
    %1 = vector.load %arg3[%c0_1, %c0_2] : memref<32x32xf32, #tpu.memory_space<vmem>>, vector<32x32xf32>
    %c0_3 = arith.constant 0 : index
    %c0_4 = arith.constant 0 : index
    %2 = vector.load %arg4[%c0_3, %c0_4] : memref<32x1xf32, #tpu.memory_space<vmem>>, vector<32x1xf32>
    %c0_5 = arith.constant 0 : index
    %c0_6 = arith.constant 0 : index
    %3 = vector.load %arg5[%c0_5, %c0_6] : memref<1x32xf32, #tpu.memory_space<vmem>>, vector<1x32xf32>
    %c0_7 = arith.constant 0 : index
    %c0_8 = arith.constant 0 : index
    %4 = memref.load %arg6[%c0_7, %c0_8] : memref<1x1xf32, #tpu.memory_space<smem>>
    %c0_9 = arith.constant 0 : index
    %c0_10 = arith.constant 0 : index
    %5 = vector.load %arg7[%c0_9, %c0_10] : memref<32x128xf32, #tpu.memory_space<vmem>>, vector<32x128xf32>
    %c0_i32 = arith.constant 0 : i32
    %6 = arith.index_cast %c0_i32 : i32 to index
    %c0_11 = arith.constant 0 : index
    %7 = vector.load %arg1[%6, %c0_11] : memref<8x128xf32, #tpu.memory_space<vmem>>, vector<1x128xf32>
    %8 = vector.broadcast %0 : vector<32x1xf32> to vector<32x128xf32>
    %9 = vector.broadcast %7 : vector<1x128xf32> to vector<32x128xf32>
    %10 = arith.mulf %8, %9 : vector<32x128xf32>
    %11 = vector.broadcast %2 : vector<32x1xf32> to vector<32x128xf32>
    %12 = arith.addf %10, %11 : vector<32x128xf32>
    %cst = arith.constant dense<0.000000e+00> : vector<32x128xf32>
    %13 = tpu.matmul %1, %5, %cst {dimension_numbers = #tpu.dot_dimension_numbers<[1], [0], [0], [1], [0, 0, 1, 1], [], []>} : vector<32x32xf32>, vector<32x128xf32>, vector<32x128xf32> -> vector<32x128xf32>
    %14 = arith.addf %12, %13 : vector<32x128xf32>
    %15 = math.tanh %14 : vector<32x128xf32>
    %cst_12 = arith.constant dense<0.000000e+00> : vector<1x128xf32>
    %16 = tpu.matmul %3, %15, %cst_12 {dimension_numbers = #tpu.dot_dimension_numbers<[1], [0], [0], [1], [0, 0, 1, 1], [], []>} : vector<1x32xf32>, vector<32x128xf32>, vector<1x128xf32> -> vector<1x128xf32>
    %17 = vector.broadcast %4 : f32 to vector<1x128xf32>
    %18 = arith.addf %16, %17 : vector<1x128xf32>
    %19 = arith.index_cast %c0_i32 : i32 to index
    %c0_13 = arith.constant 0 : index
    %20 = vector.load %arg8[%19, %c0_13] : memref<8x128xf32, #tpu.memory_space<vmem>>, vector<1x128xf32>
    tpu.vector_store %arg8[%19, %c0_13], %18 {strides = array<i32>} : memref<8x128xf32, #tpu.memory_space<vmem>>, vector<1x128xf32>,
    %c1_i32 = arith.constant 1 : i32
    %21 = arith.index_cast %c1_i32 : i32 to index
    %c0_14 = arith.constant 0 : index
    %22 = vector.load %arg1[%21, %c0_14] : memref<8x128xf32, #tpu.memory_space<vmem>>, vector<1x128xf32>
    %23 = vector.broadcast %0 : vector<32x1xf32> to vector<32x128xf32>
    %24 = vector.broadcast %22 : vector<1x128xf32> to vector<32x128xf32>
    %25 = arith.mulf %23, %24 : vector<32x128xf32>
    %26 = vector.broadcast %2 : vector<32x1xf32> to vector<32x128xf32>
    %27 = arith.addf %25, %26 : vector<32x128xf32>
    %cst_15 = arith.constant dense<0.000000e+00> : vector<32x128xf32>
    %28 = tpu.matmul %1, %15, %cst_15 {dimension_numbers = #tpu.dot_dimension_numbers<[1], [0], [0], [1], [0, 0, 1, 1], [], []>} : vector<32x32xf32>, vector<32x128xf32>, vector<32x128xf32> -> vector<32x128xf32>
    %29 = arith.addf %27, %28 : vector<32x128xf32>
    %30 = math.tanh %29 : vector<32x128xf32>
    %cst_16 = arith.constant dense<0.000000e+00> : vector<1x128xf32>
    %31 = tpu.matmul %3, %30, %cst_16 {dimension_numbers = #tpu.dot_dimension_numbers<[1], [0], [0], [1], [0, 0, 1, 1], [], []>} : vector<1x32xf32>, vector<32x128xf32>, vector<1x128xf32> -> vector<1x128xf32>
    %32 = vector.broadcast %4 : f32 to vector<1x128xf32>
    %33 = arith.addf %31, %32 : vector<1x128xf32>
    %34 = arith.index_cast %c1_i32 : i32 to index
    %c0_17 = arith.constant 0 : index
    %35 = vector.load %arg8[%34, %c0_17] : memref<8x128xf32, #tpu.memory_space<vmem>>, vector<1x128xf32>
    tpu.vector_store %arg8[%34, %c0_17], %33 {strides = array<i32>} : memref<8x128xf32, #tpu.memory_space<vmem>>, vector<1x128xf32>,
    %c2_i32 = arith.constant 2 : i32
    %36 = arith.index_cast %c2_i32 : i32 to index
    %c0_18 = arith.constant 0 : index
    %37 = vector.load %arg1[%36, %c0_18] : memref<8x128xf32, #tpu.memory_space<vmem>>, vector<1x128xf32>
    %38 = vector.broadcast %0 : vector<32x1xf32> to vector<32x128xf32>
    %39 = vector.broadcast %37 : vector<1x128xf32> to vector<32x128xf32>
    %40 = arith.mulf %38, %39 : vector<32x128xf32>
    %41 = vector.broadcast %2 : vector<32x1xf32> to vector<32x128xf32>
    %42 = arith.addf %40, %41 : vector<32x128xf32>
    %cst_19 = arith.constant dense<0.000000e+00> : vector<32x128xf32>
    %43 = tpu.matmul %1, %30, %cst_19 {dimension_numbers = #tpu.dot_dimension_numbers<[1], [0], [0], [1], [0, 0, 1, 1], [], []>} : vector<32x32xf32>, vector<32x128xf32>, vector<32x128xf32> -> vector<32x128xf32>
    %44 = arith.addf %42, %43 : vector<32x128xf32>
    %45 = math.tanh %44 : vector<32x128xf32>
    %cst_20 = arith.constant dense<0.000000e+00> : vector<1x128xf32>
    %46 = tpu.matmul %3, %45, %cst_20 {dimension_numbers = #tpu.dot_dimension_numbers<[1], [0], [0], [1], [0, 0, 1, 1], [], []>} : vector<1x32xf32>, vector<32x128xf32>, vector<1x128xf32> -> vector<1x128xf32>
    %47 = vector.broadcast %4 : f32 to vector<1x128xf32>
    %48 = arith.addf %46, %47 : vector<1x128xf32>
    %49 = arith.index_cast %c2_i32 : i32 to index
    %c0_21 = arith.constant 0 : index
    %50 = vector.load %arg8[%49, %c0_21] : memref<8x128xf32, #tpu.memory_space<vmem>>, vector<1x128xf32>
    tpu.vector_store %arg8[%49, %c0_21], %48 {strides = array<i32>} : memref<8x128xf32, #tpu.memory_space<vmem>>, vector<1x128xf32>,
    %c3_i32 = arith.constant 3 : i32
    %51 = arith.index_cast %c3_i32 : i32 to index
    %c0_22 = arith.constant 0 : index
    %52 = vector.load %arg1[%51, %c0_22] : memref<8x128xf32, #tpu.memory_space<vmem>>, vector<1x128xf32>
    %53 = vector.broadcast %0 : vector<32x1xf32> to vector<32x128xf32>
    %54 = vector.broadcast %52 : vector<1x128xf32> to vector<32x128xf32>
    %55 = arith.mulf %53, %54 : vector<32x128xf32>
    %56 = vector.broadcast %2 : vector<32x1xf32> to vector<32x128xf32>
    %57 = arith.addf %55, %56 : vector<32x128xf32>
    %cst_23 = arith.constant dense<0.000000e+00> : vector<32x128xf32>
    %58 = tpu.matmul %1, %45, %cst_23 {dimension_numbers = #tpu.dot_dimension_numbers<[1], [0], [0], [1], [0, 0, 1, 1], [], []>} : vector<32x32xf32>, vector<32x128xf32>, vector<32x128xf32> -> vector<32x128xf32>
    %59 = arith.addf %57, %58 : vector<32x128xf32>
    %60 = math.tanh %59 : vector<32x128xf32>
    %cst_24 = arith.constant dense<0.000000e+00> : vector<1x128xf32>
    %61 = tpu.matmul %3, %60, %cst_24 {dimension_numbers = #tpu.dot_dimension_numbers<[1], [0], [0], [1], [0, 0, 1, 1], [], []>} : vector<1x32xf32>, vector<32x128xf32>, vector<1x128xf32> -> vector<1x128xf32>
    %62 = vector.broadcast %4 : f32 to vector<1x128xf32>
    %63 = arith.addf %61, %62 : vector<1x128xf32>
    %64 = arith.index_cast %c3_i32 : i32 to index
    %c0_25 = arith.constant 0 : index
    %65 = vector.load %arg8[%64, %c0_25] : memref<8x128xf32, #tpu.memory_space<vmem>>, vector<1x128xf32>
    tpu.vector_store %arg8[%64, %c0_25], %63 {strides = array<i32>} : memref<8x128xf32, #tpu.memory_space<vmem>>, vector<1x128xf32>,
    %c4_i32 = arith.constant 4 : i32
    %66 = arith.index_cast %c4_i32 : i32 to index
    %c0_26 = arith.constant 0 : index
    %67 = vector.load %arg1[%66, %c0_26] : memref<8x128xf32, #tpu.memory_space<vmem>>, vector<1x128xf32>
    %68 = vector.broadcast %0 : vector<32x1xf32> to vector<32x128xf32>
    %69 = vector.broadcast %67 : vector<1x128xf32> to vector<32x128xf32>
    %70 = arith.mulf %68, %69 : vector<32x128xf32>
    %71 = vector.broadcast %2 : vector<32x1xf32> to vector<32x128xf32>
    %72 = arith.addf %70, %71 : vector<32x128xf32>
    %cst_27 = arith.constant dense<0.000000e+00> : vector<32x128xf32>
    %73 = tpu.matmul %1, %60, %cst_27 {dimension_numbers = #tpu.dot_dimension_numbers<[1], [0], [0], [1], [0, 0, 1, 1], [], []>} : vector<32x32xf32>, vector<32x128xf32>, vector<32x128xf32> -> vector<32x128xf32>
    %74 = arith.addf %72, %73 : vector<32x128xf32>
    %75 = math.tanh %74 : vector<32x128xf32>
    %cst_28 = arith.constant dense<0.000000e+00> : vector<1x128xf32>
    %76 = tpu.matmul %3, %75, %cst_28 {dimension_numbers = #tpu.dot_dimension_numbers<[1], [0], [0], [1], [0, 0, 1, 1], [], []>} : vector<1x32xf32>, vector<32x128xf32>, vector<1x128xf32> -> vector<1x128xf32>
    %77 = vector.broadcast %4 : f32 to vector<1x128xf32>
    %78 = arith.addf %76, %77 : vector<1x128xf32>
    %79 = arith.index_cast %c4_i32 : i32 to index
    %c0_29 = arith.constant 0 : index
    %80 = vector.load %arg8[%79, %c0_29] : memref<8x128xf32, #tpu.memory_space<vmem>>, vector<1x128xf32>
    tpu.vector_store %arg8[%79, %c0_29], %78 {strides = array<i32>} : memref<8x128xf32, #tpu.memory_space<vmem>>, vector<1x128xf32>,
    %c5_i32 = arith.constant 5 : i32
    %81 = arith.index_cast %c5_i32 : i32 to index
    %c0_30 = arith.constant 0 : index
    %82 = vector.load %arg1[%81, %c0_30] : memref<8x128xf32, #tpu.memory_space<vmem>>, vector<1x128xf32>
    %83 = vector.broadcast %0 : vector<32x1xf32> to vector<32x128xf32>
    %84 = vector.broadcast %82 : vector<1x128xf32> to vector<32x128xf32>
    %85 = arith.mulf %83, %84 : vector<32x128xf32>
    %86 = vector.broadcast %2 : vector<32x1xf32> to vector<32x128xf32>
    %87 = arith.addf %85, %86 : vector<32x128xf32>
    %cst_31 = arith.constant dense<0.000000e+00> : vector<32x128xf32>
    %88 = tpu.matmul %1, %75, %cst_31 {dimension_numbers = #tpu.dot_dimension_numbers<[1], [0], [0], [1], [0, 0, 1, 1], [], []>} : vector<32x32xf32>, vector<32x128xf32>, vector<32x128xf32> -> vector<32x128xf32>
    %89 = arith.addf %87, %88 : vector<32x128xf32>
    %90 = math.tanh %89 : vector<32x128xf32>
    %cst_32 = arith.constant dense<0.000000e+00> : vector<1x128xf32>
    %91 = tpu.matmul %3, %90, %cst_32 {dimension_numbers = #tpu.dot_dimension_numbers<[1], [0], [0], [1], [0, 0, 1, 1], [], []>} : vector<1x32xf32>, vector<32x128xf32>, vector<1x128xf32> -> vector<1x128xf32>
    %92 = vector.broadcast %4 : f32 to vector<1x128xf32>
    %93 = arith.addf %91, %92 : vector<1x128xf32>
    %94 = arith.index_cast %c5_i32 : i32 to index
    %c0_33 = arith.constant 0 : index
    %95 = vector.load %arg8[%94, %c0_33] : memref<8x128xf32, #tpu.memory_space<vmem>>, vector<1x128xf32>
    tpu.vector_store %arg8[%94, %c0_33], %93 {strides = array<i32>} : memref<8x128xf32, #tpu.memory_space<vmem>>, vector<1x128xf32>,
    %c6_i32 = arith.constant 6 : i32
    %96 = arith.index_cast %c6_i32 : i32 to index
    %c0_34 = arith.constant 0 : index
    %97 = vector.load %arg1[%96, %c0_34] : memref<8x128xf32, #tpu.memory_space<vmem>>, vector<1x128xf32>
    %98 = vector.broadcast %0 : vector<32x1xf32> to vector<32x128xf32>
    %99 = vector.broadcast %97 : vector<1x128xf32> to vector<32x128xf32>
    %100 = arith.mulf %98, %99 : vector<32x128xf32>
    %101 = vector.broadcast %2 : vector<32x1xf32> to vector<32x128xf32>
    %102 = arith.addf %100, %101 : vector<32x128xf32>
    %cst_35 = arith.constant dense<0.000000e+00> : vector<32x128xf32>
    %103 = tpu.matmul %1, %90, %cst_35 {dimension_numbers = #tpu.dot_dimension_numbers<[1], [0], [0], [1], [0, 0, 1, 1], [], []>} : vector<32x32xf32>, vector<32x128xf32>, vector<32x128xf32> -> vector<32x128xf32>
    %104 = arith.addf %102, %103 : vector<32x128xf32>
    %105 = math.tanh %104 : vector<32x128xf32>
    %cst_36 = arith.constant dense<0.000000e+00> : vector<1x128xf32>
    %106 = tpu.matmul %3, %105, %cst_36 {dimension_numbers = #tpu.dot_dimension_numbers<[1], [0], [0], [1], [0, 0, 1, 1], [], []>} : vector<1x32xf32>, vector<32x128xf32>, vector<1x128xf32> -> vector<1x128xf32>
    %107 = vector.broadcast %4 : f32 to vector<1x128xf32>
    %108 = arith.addf %106, %107 : vector<1x128xf32>
    %109 = arith.index_cast %c6_i32 : i32 to index
    %c0_37 = arith.constant 0 : index
    %110 = vector.load %arg8[%109, %c0_37] : memref<8x128xf32, #tpu.memory_space<vmem>>, vector<1x128xf32>
    tpu.vector_store %arg8[%109, %c0_37], %108 {strides = array<i32>} : memref<8x128xf32, #tpu.memory_space<vmem>>, vector<1x128xf32>,
    %c7_i32 = arith.constant 7 : i32
    %111 = arith.index_cast %c7_i32 : i32 to index
    %c0_38 = arith.constant 0 : index
    %112 = vector.load %arg1[%111, %c0_38] : memref<8x128xf32, #tpu.memory_space<vmem>>, vector<1x128xf32>
    %113 = vector.broadcast %0 : vector<32x1xf32> to vector<32x128xf32>
    %114 = vector.broadcast %112 : vector<1x128xf32> to vector<32x128xf32>
    %115 = arith.mulf %113, %114 : vector<32x128xf32>
    %116 = vector.broadcast %2 : vector<32x1xf32> to vector<32x128xf32>
    %117 = arith.addf %115, %116 : vector<32x128xf32>
    %cst_39 = arith.constant dense<0.000000e+00> : vector<32x128xf32>
    %118 = tpu.matmul %1, %105, %cst_39 {dimension_numbers = #tpu.dot_dimension_numbers<[1], [0], [0], [1], [0, 0, 1, 1], [], []>} : vector<32x32xf32>, vector<32x128xf32>, vector<32x128xf32> -> vector<32x128xf32>
    %119 = arith.addf %117, %118 : vector<32x128xf32>
    %120 = math.tanh %119 : vector<32x128xf32>
    %cst_40 = arith.constant dense<0.000000e+00> : vector<1x128xf32>
    %121 = tpu.matmul %3, %120, %cst_40 {dimension_numbers = #tpu.dot_dimension_numbers<[1], [0], [0], [1], [0, 0, 1, 1], [], []>} : vector<1x32xf32>, vector<32x128xf32>, vector<1x128xf32> -> vector<1x128xf32>
    %122 = vector.broadcast %4 : f32 to vector<1x128xf32>
    %123 = arith.addf %121, %122 : vector<1x128xf32>
    %124 = arith.index_cast %c7_i32 : i32 to index
    %c0_41 = arith.constant 0 : index
    %125 = vector.load %arg8[%124, %c0_41] : memref<8x128xf32, #tpu.memory_space<vmem>>, vector<1x128xf32>
    tpu.vector_store %arg8[%124, %c0_41], %123 {strides = array<i32>} : memref<8x128xf32, #tpu.memory_space<vmem>>, vector<1x128xf32>,
    %c8_i32 = arith.constant 8 : i32
    %c0_42 = arith.constant 0 : index
    %c0_43 = arith.constant 0 : index
    %126 = vector.load %arg9[%c0_42, %c0_43] : memref<32x128xf32, #tpu.memory_space<vmem>>, vector<32x128xf32>
    tpu.vector_store %arg9[%c0_42, %c0_43], %120 {strides = array<i32>} : memref<32x128xf32, #tpu.memory_space<vmem>>, vector<32x128xf32>,
    return
  }
  func.func @transform_0(%arg0: i32) -> (i32, i32) {
    %c0_i32 = arith.constant 0 : i32
    %c0_i32_0 = arith.constant 0 : i32
    return %c0_i32, %arg0 : i32, i32
  }
  func.func @transform_1(%arg0: i32) -> (i32, i32) {
    %c0_i32 = arith.constant 0 : i32
    %c0_i32_0 = arith.constant 0 : i32
    %c0_i32_1 = arith.constant 0 : i32
    return %c0_i32, %c0_i32_0 : i32, i32
  }
  func.func @transform_2(%arg0: i32) -> (i32, i32) {
    %c0_i32 = arith.constant 0 : i32
    %c0_i32_0 = arith.constant 0 : i32
    %c0_i32_1 = arith.constant 0 : i32
    return %c0_i32, %c0_i32_0 : i32, i32
  }
  func.func @transform_3(%arg0: i32) -> (i32, i32) {
    %c0_i32 = arith.constant 0 : i32
    %c0_i32_0 = arith.constant 0 : i32
    %c0_i32_1 = arith.constant 0 : i32
    return %c0_i32, %c0_i32_0 : i32, i32
  }
  func.func @transform_4(%arg0: i32) -> (i32, i32) {
    %c0_i32 = arith.constant 0 : i32
    %c0_i32_0 = arith.constant 0 : i32
    %c0_i32_1 = arith.constant 0 : i32
    return %c0_i32, %c0_i32_0 : i32, i32
  }
  func.func @transform_5(%arg0: i32) -> (i32, i32) {
    %c0_i32 = arith.constant 0 : i32
    %c0_i32_0 = arith.constant 0 : i32
    %c0_i32_1 = arith.constant 0 : i32
    return %c0_i32, %c0_i32_0 : i32, i32
  }
  func.func @transform_6(%arg0: i32) -> (i32, i32) {
    %c0_i32 = arith.constant 0 : i32
    %c0_i32_0 = arith.constant 0 : i32
    return %c0_i32, %arg0 : i32, i32
  }
  func.func @transform_7(%arg0: i32) -> (i32, i32) {
    %c0_i32 = arith.constant 0 : i32
    %c0_i32_0 = arith.constant 0 : i32
    return %c0_i32, %arg0 : i32, i32
  }
  func.func @transform_8(%arg0: i32) -> (i32, i32) {
    %c0_i32 = arith.constant 0 : i32
    %c0_i32_0 = arith.constant 0 : i32
    return %c0_i32, %arg0 : i32, i32
  }
}

</mosaic_0001>

<bundles_post_ra>
// kernel: rnn_forward.1
= control target key start
LH: loop header
LB: loop body
LE: loop exit
PB: predicated region body
PF: predicated region fallthrough
CT: control target
= control target key end

     0   :  { %v784_v0 = vmov 0   ;;  %vm97_vm0 = vcmask 261120   ;;  %s1145_s6 = inlined_call_operand.vmem [shape: f32[32,128], index: 6, kind: input, shape index: {}]   ;;  %s1146_s3 = inlined_call_operand.vmem [shape: f32[32,1], index: 3, kind: input, shape index: {}]   ;;  %s1147_s1 = inlined_call_operand.vmem [shape: f32[32,1], index: 1, kind: input, shape index: {}]   ;;  %s1148_s2 = inlined_call_operand.vmem [shape: f32[32,32], index: 2, kind: input, shape index: {}]   ;;  %s1149_s0 = inlined_call_operand.vmem [shape: f32[8,128], index: 0, kind: input, shape index: {}]   ;;  %s1150_s4 = inlined_call_operand.vmem [shape: f32[1,32], index: 4, kind: input, shape index: {}]   ;;  %s1151_s5 = inlined_call_operand.<no memory space> [shape: f32[1,1], index: 5, kind: input, shape index: {}]   ;;  %s1152_s7 = inlined_call_operand.vmem [shape: f32[8,128], index: 7, kind: output, shape index: {0}]   ;;  %s1153_s8 = inlined_call_operand.vmem [shape: f32[32,128], index: 8, kind: output, shape index: {1}]  }
   0x1   :  { %710 = vset.pattern.permute.xlu1 %v784_v0  ;;  %709 = vset.pattern.permute.xlu0 %v784_v0  ;;  %v46_v1 = vld [vmem:[%s1145_s6 + $0x18] sm:$0xff]  ;;  %v45_v4 = vld [vmem:[%s1145_s6 + $0x10] sm:$0xff]  ;;  %v44_v5 = vld [vmem:[%s1145_s6 + $0x8] sm:$0xff] }
   0x2   :  { %v40_v2 = vld [vmem:[%s1146_s3 + $0x18] sm:$0xff]  ;;  %122 = vmatpush.msra.mxu0 %v46_v1  ;;  %700 = vmatpush.msra.mxu1 %v46_v1  ;;  %v43_v6 = vld [vmem:[%s1145_s6] sm:$0xff]  ;;  %v856_v8 = vld [vmem:[%s1148_s2 + $0x10] sm:$0xff] }
   0x3   :  { %v32_v3 = vld [vmem:[%s1147_s1 + $0x18] sm:$0xff]  ;;  %701 = vmatpush.msra.mxu2 %v46_v1  ;;  %90 = vperm.xlu1 %710, %v40_v2   ;;  %v851_v7 = vld [vmem:[%s1148_s2] sm:$0xff]  ;;  %v39_v9 = vld [vmem:[%s1146_s3 + $0x10] sm:$0xff] }
   0x4   :  { %65 = vperm.xlu0 %709, %v32_v3   ;;  %123 = vmatpush.msra.mxu0 %v45_v4  ;;  %v864_v10 = vld [vmem:[%s1148_s2 + $0x18] sm:$0xff]  ;;  %v30_v11 = vld [vmem:[%s1147_s1 + $0x8] sm:$0xff]  ;;  %v31_v12 = vld [vmem:[%s1147_s1 + $0x10] sm:$0xff] }
   0x5   :  { %702 = vmatpush.msra.mxu1 %v45_v4  ;;  %703 = vmatpush.msra.mxu2 %v45_v4  ;;  %v29_v13 = vld [vmem:[%s1147_s1] sm:$0xff]  ;;  %v884_v14 = vld [vmem:[%s1148_s2 + $0x8] sm:$0xff] }
   0x6   :  { %124 = vmatpush.msra.mxu0 %v44_v5  ;;  %711 = vset.pattern.permute.xlu2 %v784_v0  ;;  %v37_v15 = vld [vmem:[%s1146_s3] sm:$0xff]  ;;  %v38_v16 = vld [vmem:[%s1146_s3 + $0x8] sm:$0xff] }
   0x7   :  { %704 = vmatpush.msra.mxu1 %v44_v5  ;;  %705 = vmatpush.msra.mxu2 %v44_v5  ;;  %v713_v17 = vld [vmem:[%s1149_s0 + $0x1] ss:$0 sm:$0xff]  ;;  %v714_v19 = vld [vmem:[%s1149_s0 + $0x2] ss:$0 sm:$0xff]  ;;  %v715_v20 = vld [vmem:[%s1149_s0 + $0x3] ss:$0 sm:$0xff] }
   0x8   :  { %125 = vmatpush.msra.mxu0 %v43_v6  ;;  %85 = vperm.xlu2 %711, %v39_v9   ;;  %v716_v21 = vld [vmem:[%s1149_s0 + $0x4] ss:$0 sm:$0xff]  ;;  %v717_v22 = vld [vmem:[%s1149_s0 + $0x5] ss:$0 sm:$0xff]  ;;  %v718_v23 = vld [vmem:[%s1149_s0 + $0x6] ss:$0 sm:$0xff] }
   0x9   :  { %706 = vmatpush.msra.mxu1 %v43_v6  ;;  %707 = vmatpush.msra.mxu2 %v43_v6  ;;  %v719_v24 = vld [vmem:[%s1149_s0 + $0x7] ss:$0 sm:$0xff]  ;;  %v712_v47 = vld [vmem:[%s1149_s0] ss:$0 sm:$0xff] }
   0xa   :  { %660 = vmatmul.msk.f32.vlgmr.msra.gmra.mxu0 %vm97_vm0, %v851_v7  ;;  %662 = vmatmul.msk.f32.vlgmr.msra.gmra.mxu1 %vm97_vm0, %v856_v8 }
   0xb   :  { %663 = vmatmul.msk.f32.vlgmr.msra.gmra.mxu2 %vm97_vm0, %v864_v10  ;;  %55 = vperm.xlu1 %710, %v30_v11  }
   0xc   :  { %60 = vperm.xlu0 %709, %v31_v12  }
  0x10   :  { %50 = vperm.xlu2 %711, %v29_v13  }
  0x12   :  { %661 = vmatmul.msk.f32.gmra.mxu0 %vm97_vm0, %v884_v14 }
  0x13   :  { %75 = vperm.xlu1 %710, %v37_v15  }
  0x14   :  { %80 = vperm.xlu0 %709, %v38_v16  }
  0x62   :  { %v897_v18 = vpop.permute.xlu2 %85 }
  0x6a   :  { %v51_v42 = vpop.permute.xlu2 %50 }
  0x6b   :  { %v174_v48 = vmul.f32 %v713_v17, %v51_v42  ;;  %v242_v52 = vmul.f32 %v714_v19, %v51_v42  ;;  %v310_v55 = vmul.f32 %v715_v20, %v51_v42  ;;  %v378_v59 = vmul.f32 %v716_v21, %v51_v42 }
  0x6c   :  { %v446_v60 = vmul.f32 %v717_v22, %v51_v42  ;;  %v514_v61 = vmul.f32 %v718_v23, %v51_v42  ;;  %v582_v2 = vmul.f32 %v719_v24, %v51_v42 }
  0x75   :  { %v917_v25 = vpop.permute.xlu1 %90 }
  0x76   :  { %v66_v26 = vpop.permute.xlu0 %65 }
  0x77   :  { %v177_v27 = vmul.f32 %v713_v17, %v66_v26  ;;  %v245_v28 = vmul.f32 %v714_v19, %v66_v26  ;;  %v313_v29 = vmul.f32 %v715_v20, %v66_v26  ;;  %v381_v30 = vmul.f32 %v716_v21, %v66_v26 }
  0x78   :  { %v449_v31 = vmul.f32 %v717_v22, %v66_v26  ;;  %v517_v32 = vmul.f32 %v718_v23, %v66_v26  ;;  %v585_v33 = vmul.f32 %v719_v24, %v66_v26  ;;  %v72_v63 = vmul.f32 %v712_v47, %v66_v26 }
  0x79   :  { %v920_v34 = vadd.f32 %v177_v27, %v917_v25  ;;  %v923_v35 = vadd.f32 %v245_v28, %v917_v25  ;;  %v926_v36 = vadd.f32 %v313_v29, %v917_v25  ;;  %v929_v37 = vadd.f32 %v381_v30, %v917_v25 }
  0x7a   :  { %v932_v38 = vadd.f32 %v449_v31, %v917_v25  ;;  %v935_v39 = vadd.f32 %v517_v32, %v917_v25  ;;  %v938_v40 = vadd.f32 %v585_v33, %v917_v25 }
  0x7d   :  { %v56_v41 = vpop.permute.xlu1 %55 }
  0x7e   :  { %v61_v43 = vpop.permute.xlu0 %60  ;;  %v175_v0 = vmul.f32 %v713_v17, %v56_v41  ;;  %v243_v4 = vmul.f32 %v714_v19, %v56_v41  ;;  %v311_v5 = vmul.f32 %v715_v20, %v56_v41  ;;  %v379_v6 = vmul.f32 %v716_v21, %v56_v41 }
  0x7f   :  { %v176_v44 = vmul.f32 %v713_v17, %v61_v43  ;;  %v244_v45 = vmul.f32 %v714_v19, %v61_v43  ;;  %v312_v46 = vmul.f32 %v715_v20, %v61_v43  ;;  %v380_v49 = vmul.f32 %v716_v21, %v61_v43 }
  0x80   :  { %v448_v50 = vmul.f32 %v717_v22, %v61_v43  ;;  %v516_v58 = vmul.f32 %v718_v23, %v61_v43  ;;  %v584_v62 = vmul.f32 %v719_v24, %v61_v43  ;;  %v447_v16 = vmul.f32 %v717_v22, %v56_v41 }
  0x81   :  { %v944_v51 = vadd.f32 %v176_v44, %v897_v18  ;;  %v947_v53 = vadd.f32 %v244_v45, %v897_v18  ;;  %v950_v54 = vadd.f32 %v312_v46, %v897_v18  ;;  %v953_v56 = vadd.f32 %v380_v49, %v897_v18 }
  0x82   :  { %v956_v57 = vadd.f32 %v448_v50, %v897_v18  ;;  %v959_v1 = vadd.f32 %v516_v58, %v897_v18  ;;  %v962_v9 = vadd.f32 %v584_v62, %v897_v18  ;;  %v515_v19 = vmul.f32 %v718_v23, %v56_v41 }
  0x83   :  { %v71_v20 = vmul.f32 %v712_v47, %v61_v43  ;;  %v583_v30 = vmul.f32 %v719_v24, %v56_v41  ;;  %v69_v46 = vmul.f32 %v712_v47, %v51_v42  ;;  %v70_v49 = vmul.f32 %v712_v47, %v56_v41  ;;  %v1003_v41 = vld [vmem:[%s1150_s4] sm:$0x1] }
  0x85   :  { %v76_v3 = vpop.permute.xlu1 %75  ;;  %v95_v43 = vadd.f32 %v897_v18, %v71_v20 }
  0x86   :  { %v81_v11 = vpop.permute.xlu0 %80  ;;  %v964_v12 = vadd.f32 %v174_v48, %v76_v3  ;;  %v966_v13 = vadd.f32 %v242_v52, %v76_v3  ;;  %v968_v15 = vadd.f32 %v310_v55, %v76_v3  ;;  %v974_v21 = vadd.f32 %v378_v59, %v76_v3 }
  0x87   :  { %v127_v17 = vpop.f32.mrf.mxu0  ;;  %v179_v26 = vadd.f32 %v175_v0, %v81_v11  ;;  %v970_v27 = vadd.f32 %v243_v4, %v81_v11  ;;  %v972_v28 = vadd.f32 %v311_v5, %v81_v11  ;;  %v976_v29 = vadd.f32 %v379_v6, %v81_v11  ;;  %v133_v23 = vpop.f32.mrf.mxu1 }
  0x88   :  { %v978_v31 = vadd.f32 %v446_v60, %v76_v3  ;;  %v980_v32 = vadd.f32 %v447_v16, %v81_v11  ;;  %v982_v33 = vadd.f32 %v514_v61, %v76_v3  ;;  %v984_v22 = vadd.f32 %v515_v19, %v81_v11 }
  0x89   :  { %v986_v44 = vadd.f32 %v582_v2, %v76_v3  ;;  %v988_v45 = vadd.f32 %v583_v30, %v81_v11  ;;  %v96_v48 = vadd.f32 %v917_v25, %v72_v63  ;;  %v93_v50 = vadd.f32 %v76_v3, %v69_v46 }
  0x8a   :  { %v141_v52 = vadd.f32 %v133_v23, %v95_v43  ;;  %v94_v58 = vadd.f32 %v81_v11, %v70_v49 }
  0x8b   :  { %v139_v61 = vadd.f32 %v127_v17, %v93_v50 }
  0x8e   :  { %v136_v24 = vpop.f32.mrf.mxu2 }
  0x8f   :  { %v142_v55 = vadd.f32 %v136_v24, %v96_v48  ;;  %v130_v59 = vpop.f32.mrf.mxu0 }
  0x90   :  { %v140_v60 = vadd.f32 %v130_v59, %v94_v58 }
  0x91   :  { %720 = vtanh.f32 %v142_v55 }
  0x92   :  { %722 = vtanh.f32 %v141_v52 }
  0x93   :  { %724 = vtanh.f32 %v140_v60 }
  0x94   :  { %726 = vtanh.f32 %v139_v61 }
  0x97   :  { %v721_v62 = vpop.eup %720 }
  0x98   :  { %163 = vmatpush.msrb.mxu1 %v721_v62  ;;  %194 = vmatpush.msrb.mxu2 %v721_v62  ;;  %v723_v42 = vpop.eup %722 }
  0x99   :  { %v725_v18 = vpop.eup %724 }
  0x9a   :  { %164 = vmatpush.msrb.mxu1 %v723_v42  ;;  %195 = vmatpush.msrb.mxu2 %v723_v42  ;;  %v727_v25 = vpop.eup %726 }
  0x9c   :  { %165 = vmatpush.msrb.mxu1 %v725_v18  ;;  %196 = vmatpush.msrb.mxu2 %v725_v18 }
  0x9e   :  { %166 = vmatpush.msrb.mxu1 %v727_v25  ;;  %197 = vmatpush.msrb.mxu2 %v727_v25 }
  0x9f   :  { %665 = vmatmul.msk.f32.vlgmr.msrb.gmra.mxu2 %vm97_vm0, %v851_v7  ;;  %664 = vmatmul.msk.f32.vlgmr.msrb.gmra.mxu1 %vm97_vm0, %v1003_v41 }
  0xa7   :  { %666 = vmatmul.msk.f32.gmra.mxu2 %vm97_vm0, %v884_v14 }
  0xaf   :  { %667 = vmatmul.msk.f32.gmra.mxu2 %vm97_vm0, %v856_v8 }
  0xb7   :  { %668 = vmatmul.msk.f32.gmra.mxu2 %vm97_vm0, %v864_v10 }
 0x122   :  { %v199_v47 = vpop.f32.mrf.mxu2 }
 0x123   :  { %v211_v6 = vadd.f32 %v199_v47, %v964_v12 }
 0x12a   :  { %v202_v63 = vpop.f32.mrf.mxu2 }
 0x12b   :  { %v212_v5 = vadd.f32 %v202_v63, %v179_v26 }
 0x132   :  { %v205_v0 = vpop.f32.mrf.mxu2 }
 0x133   :  { %v213_v3 = vadd.f32 %v205_v0, %v944_v51  ;;  %v168_v51 = vpop.f32.mrf.mxu1 }
 0x13a   :  { %v208_v2 = vpop.f32.mrf.mxu2 }
 0x13b   :  { %v214_v4 = vadd.f32 %v208_v2, %v920_v34  ;;  %v1023_v34 = vstv %s1151_s5 }
 0x13c   :  { %v169_v12 = vadd.f32 %v168_v51, %v1023_v34 }
 0x13d   :  { %728 = vtanh.f32 %v214_v4 }
 0x13e   :  { %730 = vtanh.f32 %v213_v3  ;;  %171 = vst [vmem:[%s1152_s7] sm:$0x1] %v169_v12 }
 0x13f   :  { %732 = vtanh.f32 %v212_v5 }
 0x140   :  { %734 = vtanh.f32 %v211_v6 }
 0x143   :  { %v729_v11 = vpop.eup %728 }
 0x144   :  { %231 = vmatpush.msra.mxu3 %v729_v11  ;;  %262 = vmatpush.msra.mxu1 %v729_v11  ;;  %v731_v16 = vpop.eup %730 }
 0x145   :  { %v733_v17 = vpop.eup %732 }
 0x146   :  { %232 = vmatpush.msra.mxu3 %v731_v16  ;;  %263 = vmatpush.msra.mxu1 %v731_v16  ;;  %v735_v19 = vpop.eup %734 }
 0x148   :  { %233 = vmatpush.msra.mxu3 %v733_v17  ;;  %264 = vmatpush.msra.mxu1 %v733_v17 }
 0x14a   :  { %234 = vmatpush.msra.mxu3 %v735_v19  ;;  %265 = vmatpush.msra.mxu1 %v735_v19 }
 0x14b   :  { %670 = vmatmul.msk.f32.vlgmr.msra.gmra.mxu1 %vm97_vm0, %v851_v7  ;;  %669 = vmatmul.msk.f32.vlgmr.msra.gmra.mxu3 %vm97_vm0, %v1003_v41 }
 0x153   :  { %671 = vmatmul.msk.f32.gmra.mxu1 %vm97_vm0, %v884_v14 }
 0x15b   :  { %672 = vmatmul.msk.f32.gmra.mxu1 %vm97_vm0, %v856_v8 }
 0x163   :  { %673 = vmatmul.msk.f32.gmra.mxu1 %vm97_vm0, %v864_v10 }
 0x1c8   :  { %v267_v26 = vpop.f32.mrf.mxu1 }
 0x1c9   :  { %v279_v49 = vadd.f32 %v267_v26, %v966_v13 }
 0x1d0   :  { %v270_v20 = vpop.f32.mrf.mxu1 }
 0x1d1   :  { %v280_v48 = vadd.f32 %v270_v20, %v970_v27 }
 0x1d8   :  { %v273_v30 = vpop.f32.mrf.mxu1 }
 0x1d9   :  { %v281_v23 = vadd.f32 %v273_v30, %v947_v53 }
 0x1e0   :  { %v276_v46 = vpop.f32.mrf.mxu1 }
 0x1e1   :  { %v282_v43 = vadd.f32 %v276_v46, %v923_v35  ;;  %v236_v35 = vpop.f32.mrf.mxu3 }
 0x1e2   :  { %v237_v53 = vadd.f32 %v236_v35, %v1023_v34 }
 0x1e3   :  { %736 = vtanh.f32 %v282_v43 }
 0x1e4   :  { %738 = vtanh.f32 %v281_v23  ;;  %239 = vst [vmem:[%s1152_s7 + $0x1] sm:$0x1] %v237_v53 }
 0x1e5   :  { %740 = vtanh.f32 %v280_v48 }
 0x1e6   :  { %742 = vtanh.f32 %v279_v49 }
 0x1e9   :  { %v737_v24 = vpop.eup %736 }
 0x1ea   :  { %299 = vmatpush.msrb.mxu3 %v737_v24  ;;  %v739_v50 = vpop.eup %738 }
 0x1eb   :  { %v741_v52 = vpop.eup %740 }
 0x1ec   :  { %300 = vmatpush.msrb.mxu3 %v739_v50  ;;  %v743_v55 = vpop.eup %742 }
 0x1ee   :  { %301 = vmatpush.msrb.mxu3 %v741_v52 }
 0x1f0   :  { %302 = vmatpush.msrb.mxu3 %v743_v55 }
 0x1f1   :  { %674 = vmatmul.msk.f32.vlgmr.msrb.gmra.mxu3 %vm97_vm0, %v1003_v41 }
 0x1f2   :  { %330 = vmatpush.msra.mxu3 %v737_v24 }
 0x1f4   :  { %331 = vmatpush.msra.mxu3 %v739_v50 }
 0x1f6   :  { %332 = vmatpush.msra.mxu3 %v741_v52 }
 0x1f8   :  { %333 = vmatpush.msra.mxu3 %v743_v55 }
 0x1f9   :  { %675 = vmatmul.msk.f32.vlgmr.msra.gmra.mxu3 %vm97_vm0, %v851_v7 }
 0x201   :  { %676 = vmatmul.msk.f32.gmra.mxu3 %vm97_vm0, %v884_v14 }
 0x209   :  { %677 = vmatmul.msk.f32.gmra.mxu3 %vm97_vm0, %v856_v8 }
 0x211   :  { %678 = vmatmul.msk.f32.gmra.mxu3 %vm97_vm0, %v864_v10 }
 0x274   :  { %v304_v13 = vpop.f32.mrf.mxu3 }
 0x275   :  { %v305_v27 = vadd.f32 %v304_v13, %v1023_v34 }
 0x277   :  { %307 = vst [vmem:[%s1152_s7 + $0x2] sm:$0x1] %v305_v27 }
 0x27c   :  { %v335_v58 = vpop.f32.mrf.mxu3 }
 0x27d   :  { %v347_v25 = vadd.f32 %v335_v58, %v968_v15 }
 0x284   :  { %v338_v59 = vpop.f32.mrf.mxu3 }
 0x285   :  { %v348_v18 = vadd.f32 %v338_v59, %v972_v28 }
 0x28c   :  { %v341_v60 = vpop.f32.mrf.mxu3 }
 0x28d   :  { %v349_v62 = vadd.f32 %v341_v60, %v950_v54 }
 0x294   :  { %v344_v61 = vpop.f32.mrf.mxu3 }
 0x295   :  { %v350_v42 = vadd.f32 %v344_v61, %v926_v36 }
 0x297   :  { %744 = vtanh.f32 %v350_v42 }
 0x298   :  { %746 = vtanh.f32 %v349_v62 }
 0x299   :  { %748 = vtanh.f32 %v348_v18 }
 0x29a   :  { %750 = vtanh.f32 %v347_v25 }
 0x29d   :  { %v745_v47 = vpop.eup %744 }
 0x29e   :  { %367 = vmatpush.msrb.mxu0 %v745_v47  ;;  %398 = vmatpush.msra.mxu2 %v745_v47  ;;  %v747_v63 = vpop.eup %746 }
 0x29f   :  { %v749_v0 = vpop.eup %748 }
 0x2a0   :  { %368 = vmatpush.msrb.mxu0 %v747_v63  ;;  %399 = vmatpush.msra.mxu2 %v747_v63  ;;  %v751_v54 = vpop.eup %750 }
 0x2a2   :  { %369 = vmatpush.msrb.mxu0 %v749_v0  ;;  %400 = vmatpush.msra.mxu2 %v749_v0 }
 0x2a4   :  { %370 = vmatpush.msrb.mxu0 %v751_v54  ;;  %401 = vmatpush.msra.mxu2 %v751_v54 }
 0x2a5   :  { %680 = vmatmul.msk.f32.vlgmr.msra.gmra.mxu2 %vm97_vm0, %v851_v7  ;;  %679 = vmatmul.msk.f32.vlgmr.msrb.gmra.mxu0 %vm97_vm0, %v1003_v41 }
 0x2ad   :  { %681 = vmatmul.msk.f32.gmra.mxu2 %vm97_vm0, %v884_v14 }
 0x2b5   :  { %682 = vmatmul.msk.f32.gmra.mxu2 %vm97_vm0, %v856_v8 }
 0x2bd   :  { %683 = vmatmul.msk.f32.gmra.mxu2 %vm97_vm0, %v864_v10 }
 0x328   :  { %v403_v36 = vpop.f32.mrf.mxu2 }
 0x329   :  { %v415_v6 = vadd.f32 %v403_v36, %v974_v21 }
 0x330   :  { %v406_v15 = vpop.f32.mrf.mxu2 }
 0x331   :  { %v416_v5 = vadd.f32 %v406_v15, %v976_v29 }
 0x338   :  { %v409_v28 = vpop.f32.mrf.mxu2 }
 0x339   :  { %v417_v3 = vadd.f32 %v409_v28, %v953_v56 }
 0x340   :  { %v412_v2 = vpop.f32.mrf.mxu2 }
 0x341   :  { %v418_v4 = vadd.f32 %v412_v2, %v929_v37 }
 0x343   :  { %752 = vtanh.f32 %v418_v4 }
 0x344   :  { %754 = vtanh.f32 %v417_v3 }
 0x345   :  { %756 = vtanh.f32 %v416_v5 }
 0x346   :  { %758 = vtanh.f32 %v415_v6 }
 0x349   :  { %v753_v11 = vpop.eup %752 }
 0x34a   :  { %435 = vmatpush.msra.mxu0 %v753_v11  ;;  %466 = vmatpush.msrb.mxu1 %v753_v11  ;;  %v755_v16 = vpop.eup %754 }
 0x34b   :  { %v757_v17 = vpop.eup %756 }
 0x34c   :  { %436 = vmatpush.msra.mxu0 %v755_v16  ;;  %467 = vmatpush.msrb.mxu1 %v755_v16  ;;  %v759_v56 = vpop.eup %758 }
 0x34e   :  { %437 = vmatpush.msra.mxu0 %v757_v17  ;;  %468 = vmatpush.msrb.mxu1 %v757_v17 }
 0x350   :  { %438 = vmatpush.msra.mxu0 %v759_v56  ;;  %469 = vmatpush.msrb.mxu1 %v759_v56 }
 0x351   :  { %685 = vmatmul.msk.f32.vlgmr.msrb.gmra.mxu1 %vm97_vm0, %v851_v7  ;;  %684 = vmatmul.msk.f32.vlgmr.msra.gmra.mxu0 %vm97_vm0, %v1003_v41 }
 0x359   :  { %686 = vmatmul.msk.f32.gmra.mxu1 %vm97_vm0, %v884_v14 }
 0x361   :  { %687 = vmatmul.msk.f32.gmra.mxu1 %vm97_vm0, %v856_v8 }
 0x369   :  { %688 = vmatmul.msk.f32.gmra.mxu1 %vm97_vm0, %v864_v10 }
 0x3ce   :  { %v471_v37 = vpop.f32.mrf.mxu1 }
 0x3cf   :  { %v483_v20 = vadd.f32 %v471_v37, %v978_v31 }
 0x3d6   :  { %v474_v21 = vpop.f32.mrf.mxu1 }
 0x3d7   :  { %v484_v26 = vadd.f32 %v474_v21, %v980_v32 }
 0x3de   :  { %v477_v29 = vpop.f32.mrf.mxu1 }
 0x3df   :  { %v485_v51 = vadd.f32 %v477_v29, %v956_v57 }
 0x3e6   :  { %v480_v19 = vpop.f32.mrf.mxu1 }
 0x3e7   :  { %v486_v12 = vadd.f32 %v480_v19, %v932_v38 }
 0x3e9   :  { %760 = vtanh.f32 %v486_v12 }
 0x3ea   :  { %762 = vtanh.f32 %v485_v51 }
 0x3eb   :  { %764 = vtanh.f32 %v484_v26 }
 0x3ec   :  { %766 = vtanh.f32 %v483_v20 }
 0x3ef   :  { %v761_v30 = vpop.eup %760 }
 0x3f0   :  { %503 = vmatpush.msrb.mxu0 %v761_v30  ;;  %534 = vmatpush.msrb.mxu3 %v761_v30  ;;  %v763_v46 = vpop.eup %762 }
 0x3f1   :  { %v765_v23 = vpop.eup %764 }
 0x3f2   :  { %504 = vmatpush.msrb.mxu0 %v763_v46  ;;  %535 = vmatpush.msrb.mxu3 %v763_v46  ;;  %v767_v57 = vpop.eup %766 }
 0x3f4   :  { %505 = vmatpush.msrb.mxu0 %v765_v23  ;;  %536 = vmatpush.msrb.mxu3 %v765_v23 }
 0x3f6   :  { %506 = vmatpush.msrb.mxu0 %v767_v57  ;;  %537 = vmatpush.msrb.mxu3 %v767_v57 }
 0x3f7   :  { %690 = vmatmul.msk.f32.vlgmr.msrb.gmra.mxu3 %vm97_vm0, %v851_v7  ;;  %689 = vmatmul.msk.f32.vlgmr.msrb.gmra.mxu0 %vm97_vm0, %v1003_v41 }
 0x3ff   :  { %691 = vmatmul.msk.f32.gmra.mxu3 %vm97_vm0, %v884_v14 }
 0x407   :  { %692 = vmatmul.msk.f32.gmra.mxu3 %vm97_vm0, %v856_v8 }
 0x40f   :  { %693 = vmatmul.msk.f32.gmra.mxu3 %vm97_vm0, %v864_v10 }
 0x47a   :  { %v539_v38 = vpop.f32.mrf.mxu3 }
 0x47b   :  { %v551_v50 = vadd.f32 %v539_v38, %v982_v33 }
 0x482   :  { %v542_v31 = vpop.f32.mrf.mxu3 }
 0x483   :  { %v552_v24 = vadd.f32 %v542_v31, %v984_v22 }
 0x48a   :  { %v545_v32 = vpop.f32.mrf.mxu3 }
 0x48b   :  { %v553_v48 = vadd.f32 %v545_v32, %v959_v1 }
 0x492   :  { %v548_v43 = vpop.f32.mrf.mxu3 }
 0x493   :  { %v554_v49 = vadd.f32 %v548_v43, %v935_v39  ;;  %v372_v39 = vpop.f32.mrf.mxu0 }
 0x494   :  { %v373_v1 = vadd.f32 %v372_v39, %v1023_v34 }
 0x495   :  { %768 = vtanh.f32 %v554_v49 }
 0x496   :  { %770 = vtanh.f32 %v553_v48  ;;  %375 = vst [vmem:[%s1152_s7 + $0x3] sm:$0x1] %v373_v1 }
 0x497   :  { %772 = vtanh.f32 %v552_v24 }
 0x498   :  { %774 = vtanh.f32 %v551_v50 }
 0x49b   :  { %v769_v52 = vpop.eup %768  ;;  %v440_v33 = vpop.f32.mrf.mxu0 }
 0x49c   :  { %571 = vmatpush.msra.mxu0 %v769_v52  ;;  %v771_v55 = vpop.eup %770  ;;  %v441_v22 = vadd.f32 %v440_v33, %v1023_v34 }
 0x49d   :  { %v773_v35 = vpop.eup %772 }
 0x49e   :  { %572 = vmatpush.msra.mxu0 %v771_v55  ;;  %v775_v53 = vpop.eup %774  ;;  %443 = vst [vmem:[%s1152_s7 + $0x4] sm:$0x1] %v441_v22 }
 0x4a0   :  { %573 = vmatpush.msra.mxu0 %v773_v35 }
 0x4a2   :  { %574 = vmatpush.msra.mxu0 %v775_v53 }
 0x4a3   :  { %694 = vmatmul.msk.f32.vlgmr.msra.gmra.mxu0 %vm97_vm0, %v1003_v41  ;;  %v508_v13 = vpop.f32.mrf.mxu0 }
 0x4a4   :  { %602 = vmatpush.msrb.mxu0 %v769_v52  ;;  %v509_v27 = vadd.f32 %v508_v13, %v1023_v34 }
 0x4a6   :  { %603 = vmatpush.msrb.mxu0 %v771_v55  ;;  %511 = vst [vmem:[%s1152_s7 + $0x5] sm:$0x1] %v509_v27 }
 0x4a8   :  { %604 = vmatpush.msrb.mxu0 %v773_v35 }
 0x4aa   :  { %605 = vmatpush.msrb.mxu0 %v775_v53 }
 0x4ab   :  { %695 = vmatmul.msk.f32.vlgmr.msrb.gmra.mxu0 %vm97_vm0, %v851_v7 }
 0x4b3   :  { %696 = vmatmul.msk.f32.gmra.mxu0 %vm97_vm0, %v884_v14 }
 0x4bb   :  { %697 = vmatmul.msk.f32.gmra.mxu0 %vm97_vm0, %v856_v8 }
 0x4c3   :  { %698 = vmatmul.msk.f32.gmra.mxu0 %vm97_vm0, %v864_v10 }
 0x520   :  { %v576_v7 = vpop.f32.mrf.mxu0 }
 0x521   :  { %v577_v58 = vadd.f32 %v576_v7, %v1023_v34 }
 0x523   :  { %579 = vst [vmem:[%s1152_s7 + $0x6] sm:$0x1] %v577_v58 }
 0x528   :  { %v607_v14 = vpop.f32.mrf.mxu0 }
 0x529   :  { %v619_v59 = vadd.f32 %v607_v14, %v986_v44 }
 0x52b   :  { %776 = vtanh.f32 %v619_v59 }
 0x530   :  { %v610_v60 = vpop.f32.mrf.mxu0 }
 0x531   :  { %v777_v61 = vpop.eup %776  ;;  %v620_v62 = vadd.f32 %v610_v60, %v988_v45 }
 0x532   :  { %648 = vst [vmem:[%s1153_s8] sm:$0xff] %v777_v61 }
 0x533   :  { %778 = vtanh.f32 %v620_v62 }
 0x538   :  { %v613_v8 = vpop.f32.mrf.mxu0 }
 0x539   :  { %v779_v10 = vpop.eup %778  ;;  %v621_v42 = vadd.f32 %v613_v8, %v962_v9 }
 0x53a   :  { %649 = vst [vmem:[%s1153_s8 + $0x8] sm:$0xff] %v779_v10 }
 0x53b   :  { %780 = vtanh.f32 %v621_v42 }
 0x540   :  { %v616_v44 = vpop.f32.mrf.mxu0 }
 0x541   :  { %v781_v18 = vpop.eup %780  ;;  %v622_v25 = vadd.f32 %v616_v44, %v938_v40 }
 0x542   :  { %650 = vst [vmem:[%s1153_s8 + $0x10] sm:$0xff] %v781_v18 }
 0x543   :  { %782 = vtanh.f32 %v622_v25 }
 0x549   :  { %v783_v45 = vpop.eup %782 }
 0x54a   :  { %651 = vst [vmem:[%s1153_s8 + $0x18] sm:$0xff] %v783_v45  ;;  %639 = vmatpush.msrb.mxu2 %v783_v45 }
 0x54c   :  { %640 = vmatpush.msrb.mxu2 %v781_v18 }
 0x54e   :  { %641 = vmatpush.msrb.mxu2 %v779_v10 }
 0x550   :  { %642 = vmatpush.msrb.mxu2 %v777_v61 }
 0x551   :  { %699 = vmatmul.msk.f32.vlgmr.msrb.gmra.mxu2 %vm97_vm0, %v1003_v41 }
 0x5d4   :  { %v644_v9 = vpop.f32.mrf.mxu2 }
 0x5d5   :  { %v645_v40 = vadd.f32 %v644_v9, %v1023_v34 }
 0x5d7   :  { %647 = vst [vmem:[%s1152_s7 + $0x7] sm:$0x1] %v645_v40 }

</bundles_post_ra>
